<compile_context>
chip_gen: v7x
topology: tpu7x:2x2x1
jax: 0.10.0
libtpu: 0.0.40
codegen_flags: <defaults>
</compile_context>

<pallas_src>
import functools
import math

import numpy as np
import jax
import jax.numpy as jnp
from jax.experimental import pallas as pl
from jax.experimental.pallas import tpu as pltpu


def _round_up(x, m):
    return ((x + m - 1) // m) * m


def _angular_proto_loss_kernel(emb_ref, lab_ref, out_ref, *, n_valid, c_pad,
                               cos_m, sin_m, th, margin, inv_temperature,
                               easy_margin):
    emb = emb_ref[...]                    # (Bp, Dp) f32, zero-padded rows/cols
    labels = lab_ref[...]                 # (Bp, 1) int32 in [0, C); -1 = pad row
    Bp, _ = emb.shape
    Cp = c_pad

    # --- F.normalize(embeddings, p=2, dim=1): rsqrt (EUP) * mul, no divide ---
    inv_norm = jax.lax.rsqrt(
        jnp.maximum(jnp.sum(emb * emb, axis=1, keepdims=True), 1e-24))
    emb_n = emb * inv_norm                                        # (Bp, Dp)

    # --- one-hot over mapped labels; padded rows (label == -1) stay all-zero --
    class_iota = jax.lax.broadcasted_iota(jnp.int32, (Bp, Cp), 1)
    one_hot = (labels == class_iota).astype(jnp.float32)          # (Bp, Cp)

    # class-presence mask (absent / padded class columns have count == 0)
    counts = jnp.sum(one_hot, axis=0, keepdims=True)              # (1, Cp)

    # --- prototypes, oriented (Dp, Cp).  The per-class-mean 1/count factor is
    #     dropped: the L2 normalization below cancels any positive scale. ---
    proto_sum = jnp.einsum('bd,bc->dc', emb_n, one_hot,
                           preferred_element_type=jnp.float32)    # (Dp, Cp)
    inv_pnorm = jax.lax.rsqrt(
        jnp.maximum(jnp.sum(proto_sum * proto_sum, axis=0, keepdims=True),
                    1e-24))
    protos = proto_sum * inv_pnorm        # (Dp, Cp); absent columns stay zero

    # --- cosine similarity: transpose-free MXU matmul (Bp, Cp) ---
    cosine = jnp.dot(emb_n, protos, preferred_element_type=jnp.float32)

    # --- angular margin ---
    sine = jnp.sqrt(jnp.clip(1.0 - cosine * cosine, 0.0, 1.0))
    phi = cosine * cos_m - sine * sin_m
    if easy_margin:
        phi = jnp.where(cosine > 0.0, phi, cosine)
    else:
        phi = jnp.where(cosine - th > 0.0, phi, cosine - margin)

    output = jnp.where(one_hot > 0.0, phi, cosine)
    # mask absent (padded) classes out of the softmax denominator
    logits = output * inv_temperature + jnp.where(counts > 0.0, 0.0, -1e30)

    # --- cross entropy, mean over the n_valid real rows only ---
    row_max = jnp.max(logits, axis=1, keepdims=True)
    lse = jnp.log(jnp.sum(jnp.exp(logits - row_max), axis=1,
                          keepdims=True)) + row_max
    target = jnp.sum(one_hot * logits, axis=1, keepdims=True)
    row_valid = (jax.lax.broadcasted_iota(jnp.int32, (Bp, 1), 0)
                 < n_valid).astype(jnp.float32)
    loss = jnp.sum((lse - target) * row_valid) * (1.0 / n_valid)

    out_ref[0, 0] = loss


def _rank_labels(labels):
    """Device-side torch.unique-style mapping: label -> rank among the sorted
    distinct labels in the batch.  O(B^2) jnp ops, no host sync, static shapes."""
    labels = labels.astype(jnp.int32)
    idx = jnp.arange(labels.shape[0], dtype=jnp.int32)
    eq = labels[None, :] == labels[:, None]           # eq[i, j]
    earlier = idx[None, :] < idx[:, None]             # j earlier than i
    first_occ = ~jnp.any(eq & earlier, axis=1)        # first occurrence flags
    smaller = labels[None, :] < labels[:, None]       # labels[j] < labels[i]
    return jnp.sum((first_occ[None, :] & smaller).astype(jnp.int32), axis=1)


@functools.partial(jax.jit,
                   static_argnames=("scale", "margin", "easy_margin",
                                    "temperature"))
def angular_prototypical_loss(embeddings, labels, *, scale=30.0, margin=0.2,
                              easy_margin=False, temperature=0.1):
    """JAX/Pallas equivalent of AngularPrototypicalLoss.forward.

    `scale` is accepted for parity but unused (the reference forward never
    multiplies by it).
    """
    del scale
    embeddings = embeddings.astype(jnp.float32)
    B, D = embeddings.shape

    # Static, shape-derived paddings (num_classes <= B, so C_pad covers any
    # batch's class count) -> compiles once per (B, D), never per label set.
    B_pad = max(8, _round_up(B, 8))
    D_pad = max(128, _round_up(D, 128))
    C_pad = max(128, _round_up(B, 128))

    emb_p = jnp.pad(embeddings, ((0, B_pad - B), (0, D_pad - D)))
    mapped = _rank_labels(labels)                                  # (B,) int32
    lab_p = jnp.pad(mapped, (0, B_pad - B),
                    constant_values=-1).reshape(B_pad, 1)

    kernel = functools.partial(
        _angular_proto_loss_kernel,
        n_valid=B,
        c_pad=C_pad,
        cos_m=math.cos(margin),
        sin_m=math.sin(margin),
        th=math.cos(math.pi - margin),
        margin=float(margin),
        inv_temperature=1.0 / float(temperature),
        easy_margin=bool(easy_margin),
    )

    # Single VMEM block (fits easily at these sizes).  For production batches
    # (B in the hundreds+): tile the cosine/CE phase over B with a
    # ("parallel", ...) grid so v7x's two TensorCores share the batch and the
    # (B, C) working set stays under v7x's 64 MiB VMEM, and cast the two
    # matmul operands to bf16 (keep f32 accumulation).
    out = pl.pallas_call(
        kernel,
        out_shape=jax.ShapeDtypeStruct((1, 1), jnp.float32),
        in_specs=[
            pl.BlockSpec((B_pad, D_pad), lambda: (0, 0)),
            pl.BlockSpec((B_pad, 1), lambda: (0, 0)),
        ],
        out_specs=pl.BlockSpec(memory_space=pltpu.MemorySpace.SMEM),
    )(emb_p, lab_p)
    return out[0, 0]


def _reference_loss(embeddings, labels, *, margin=0.2, easy_margin=False,
                    temperature=0.1):
    """NumPy f64 reference mirroring the PyTorch module's forward."""
    emb = np.asarray(embeddings, dtype=np.float64)
    labels = np.asarray(labels)
    emb_n = emb / np.maximum(np.linalg.norm(emb, axis=1, keepdims=True), 1e-12)
    uniq = np.unique(labels)
    mapped = np.searchsorted(uniq, labels)
    protos = np.zeros((len(uniq), emb.shape[1]))
    for i, u in enumerate(uniq):
        p = emb_n[labels == u].mean(axis=0)
        protos[i] = p / np.maximum(np.linalg.norm(p), 1e-12)
    cosine = emb_n @ protos.T
    one_hot = np.zeros_like(cosine)
    one_hot[np.arange(len(labels)), mapped] = 1.0
    sine = np.sqrt(np.clip(1.0 - cosine ** 2, 0.0, 1.0))
    phi = cosine * math.cos(margin) - sine * math.sin(margin)
    th = math.cos(math.pi - margin)
    if easy_margin:
        phi = np.where(cosine > 0.0, phi, cosine)
    else:
        phi = np.where(cosine - th > 0.0, phi, cosine - margin)
    logits = (one_hot * phi + (1.0 - one_hot) * cosine) / temperature
    logits = logits - logits.max(axis=1, keepdims=True)
    logp = logits - np.log(np.exp(logits).sum(axis=1, keepdims=True))
    return float(-logp[np.arange(len(labels)), mapped].mean())


if __name__ == "__main__":
    key = jax.random.PRNGKey(0)
    B, D = 8, 32
    embeddings = jax.random.normal(key, (B, D), dtype=jnp.float32)
    # raw (unmapped) speaker labels; 3 distinct speakers, each with >= 2 samples
    labels = jnp.array([7, 3, 7, 11, 3, 11, 7, 3], dtype=jnp.int32)

    loss = angular_prototypical_loss(embeddings, labels, scale=30.0,
                                     margin=0.2, easy_margin=False,
                                     temperature=0.1)
    loss = jax.block_until_ready(loss)

    ref = _reference_loss(embeddings, labels, margin=0.2, easy_margin=False,
                          temperature=0.1)
    assert np.isfinite(float(loss))
    assert abs(float(loss) - ref) < 1e-3, (float(loss), ref)
    print("KERNEL_OK")
</pallas_src>

<mosaic_0001>
module attributes {stable_mosaic.version = 11 : i64} {
  func.func @_angular_proto_loss_kernel(%arg0: memref<8x128xf32, #tpu.memory_space<vmem>>, %arg1: memref<8x1xi32, #tpu.memory_space<vmem>>, %arg2: memref<1x1xf32, #tpu.memory_space<smem>>) attributes {dimension_semantics = [], scalar_prefetch = 0 : i64, scratch_operands = 0 : i64, tpu.core_type = #tpu.core_type<tc>} {
    %c0 = arith.constant 0 : index
    %c0_0 = arith.constant 0 : index
    %0 = vector.load %arg0[%c0, %c0_0] : memref<8x128xf32, #tpu.memory_space<vmem>>, vector<8x128xf32>
    %c0_1 = arith.constant 0 : index
    %c0_2 = arith.constant 0 : index
    %1 = vector.load %arg1[%c0_1, %c0_2] : memref<8x1xi32, #tpu.memory_space<vmem>>, vector<8x1xi32>
    %2 = arith.mulf %0, %0 : vector<8x128xf32>
    %cst = arith.constant dense<0.000000e+00> : vector<8xf32>
    %3 = vector.multi_reduction <add>, %2, %cst [1] : vector<8x128xf32> to vector<8xf32>
    %4 = vector.shape_cast %3 : vector<8xf32> to vector<8x1xf32>
    %cst_3 = arith.constant 1.000000e-24 : f32
    %5 = vector.broadcast %cst_3 : f32 to vector<8x1xf32>
    %6 = arith.maximumf %4, %5 : vector<8x1xf32>
    %7 = math.rsqrt %6 : vector<8x1xf32>
    %8 = vector.broadcast %7 : vector<8x1xf32> to vector<8x128xf32>
    %9 = arith.mulf %0, %8 : vector<8x128xf32>
    %10 = tpu.iota {dimensions = array<i32: 1>} : vector<8x128xi32>
    %11 = vector.broadcast %1 : vector<8x1xi32> to vector<8x128xi32>
    %12 = arith.cmpi eq, %11, %10 : vector<8x128xi32>
    %13 = arith.extui %12 : vector<8x128xi1> to vector<8x128xi32>
    %14 = arith.sitofp %13 : vector<8x128xi32> to vector<8x128xf32>
    %cst_4 = arith.constant dense<0.000000e+00> : vector<128xf32>
    %15 = vector.multi_reduction <add>, %14, %cst_4 [0] : vector<8x128xf32> to vector<128xf32>
    %16 = vector.shape_cast %15 : vector<128xf32> to vector<1x128xf32>
    "tpu.trace_start"() <{level = 10 : i32, message = "bd,bc->dc"}> : () -> ()
    %cst_5 = arith.constant dense<0.000000e+00> : vector<128x128xf32>
    %17 = tpu.matmul %9, %14, %cst_5 {dimension_numbers = #tpu.dot_dimension_numbers<[0], [0], [1], [1], [0, 1, 1, 1], [], []>} : vector<8x128xf32>, vector<8x128xf32>, vector<128x128xf32> -> vector<128x128xf32>
    "tpu.trace_stop"() : () -> ()
    %18 = arith.mulf %17, %17 : vector<128x128xf32>
    %cst_6 = arith.constant dense<0.000000e+00> : vector<128xf32>
    %19 = vector.multi_reduction <add>, %18, %cst_6 [0] : vector<128x128xf32> to vector<128xf32>
    %20 = vector.shape_cast %19 : vector<128xf32> to vector<1x128xf32>
    %cst_7 = arith.constant 1.000000e-24 : f32
    %21 = vector.broadcast %cst_7 : f32 to vector<1x128xf32>
    %22 = arith.maximumf %20, %21 : vector<1x128xf32>
    %23 = math.rsqrt %22 : vector<1x128xf32>
    %24 = vector.broadcast %23 : vector<1x128xf32> to vector<128x128xf32>
    %25 = arith.mulf %17, %24 : vector<128x128xf32>
    %cst_8 = arith.constant dense<0.000000e+00> : vector<8x128xf32>
    %26 = tpu.matmul %9, %25, %cst_8 {dimension_numbers = #tpu.dot_dimension_numbers<[1], [0], [0], [1], [0, 0, 1, 1], [], []>} : vector<8x128xf32>, vector<128x128xf32>, vector<8x128xf32> -> vector<8x128xf32>
    %27 = arith.mulf %26, %26 : vector<8x128xf32>
    %cst_9 = arith.constant 1.000000e+00 : f32
    %28 = vector.broadcast %cst_9 : f32 to vector<8x128xf32>
    %29 = arith.subf %28, %27 : vector<8x128xf32>
    %cst_10 = arith.constant 0.000000e+00 : f32
    %cst_11 = arith.constant 1.000000e+00 : f32
    %30 = vector.broadcast %cst_10 : f32 to vector<8x128xf32>
    %31 = arith.maximumf %30, %29 : vector<8x128xf32>
    %32 = vector.broadcast %cst_11 : f32 to vector<8x128xf32>
    %33 = arith.minimumf %32, %31 : vector<8x128xf32>
    %34 = math.sqrt %33 : vector<8x128xf32>
    %cst_12 = arith.constant 0.980066597 : f32
    %35 = vector.broadcast %cst_12 : f32 to vector<8x128xf32>
    %36 = arith.mulf %26, %35 : vector<8x128xf32>
    %cst_13 = arith.constant 0.198669329 : f32
    %37 = vector.broadcast %cst_13 : f32 to vector<8x128xf32>
    %38 = arith.mulf %34, %37 : vector<8x128xf32>
    %39 = arith.subf %36, %38 : vector<8x128xf32>
    %cst_14 = arith.constant -0.980066597 : f32
    %40 = vector.broadcast %cst_14 : f32 to vector<8x128xf32>
    %41 = arith.subf %26, %40 : vector<8x128xf32>
    %cst_15 = arith.constant 0.000000e+00 : f32
    %42 = vector.broadcast %cst_15 : f32 to vector<8x128xf32>
    %43 = arith.cmpf ogt, %41, %42 : vector<8x128xf32>
    %cst_16 = arith.constant 2.000000e-01 : f32
    %44 = vector.broadcast %cst_16 : f32 to vector<8x128xf32>
    %45 = arith.subf %26, %44 : vector<8x128xf32>
    %46 = arith.select %43, %39, %45 : vector<8x128xi1>, vector<8x128xf32>
    %cst_17 = arith.constant 0.000000e+00 : f32
    %47 = vector.broadcast %cst_17 : f32 to vector<8x128xf32>
    %48 = arith.cmpf ogt, %14, %47 : vector<8x128xf32>
    %49 = arith.select %48, %46, %26 : vector<8x128xi1>, vector<8x128xf32>
    %cst_18 = arith.constant 1.000000e+01 : f32
    %50 = vector.broadcast %cst_18 : f32 to vector<8x128xf32>
    %51 = arith.mulf %49, %50 : vector<8x128xf32>
    %cst_19 = arith.constant 0.000000e+00 : f32
    %52 = vector.broadcast %cst_19 : f32 to vector<1x128xf32>
    %53 = arith.cmpf ogt, %16, %52 : vector<1x128xf32>
    %cst_20 = arith.constant 0.000000e+00 : f32
    %cst_21 = arith.constant -1.000000e+30 : f32
    %54 = vector.broadcast %cst_20 : f32 to vector<1x128xf32>
    %55 = vector.broadcast %cst_21 : f32 to vector<1x128xf32>
    %56 = arith.select %53, %54, %55 : vector<1x128xi1>, vector<1x128xf32>
    %57 = vector.broadcast %56 : vector<1x128xf32> to vector<8x128xf32>
    %58 = arith.addf %51, %57 : vector<8x128xf32>
    %cst_22 = arith.constant dense<0xFF800000> : vector<8xf32>
    %59 = vector.multi_reduction <maximumf>, %58, %cst_22 [1] : vector<8x128xf32> to vector<8xf32>
    %60 = vector.shape_cast %59 : vector<8xf32> to vector<8x1xf32>
    %61 = vector.broadcast %60 : vector<8x1xf32> to vector<8x128xf32>
    %62 = arith.subf %58, %61 : vector<8x128xf32>
    %63 = math.exp %62 : vector<8x128xf32>
    %cst_23 = arith.constant dense<0.000000e+00> : vector<8xf32>
    %64 = vector.multi_reduction <add>, %63, %cst_23 [1] : vector<8x128xf32> to vector<8xf32>
    %65 = vector.shape_cast %64 : vector<8xf32> to vector<8x1xf32>
    %66 = math.log %65 : vector<8x1xf32>
    %67 = arith.addf %66, %60 : vector<8x1xf32>
    %68 = arith.mulf %14, %58 : vector<8x128xf32>
    %cst_24 = arith.constant dense<0.000000e+00> : vector<8xf32>
    %69 = vector.multi_reduction <add>, %68, %cst_24 [1] : vector<8x128xf32> to vector<8xf32>
    %70 = vector.shape_cast %69 : vector<8xf32> to vector<8x1xf32>
    %71 = tpu.iota {dimensions = array<i32: 0>} : vector<8x1xi32>
    %c8_i32 = arith.constant 8 : i32
    %72 = vector.broadcast %c8_i32 : i32 to vector<8x1xi32>
    %73 = arith.cmpi slt, %71, %72 : vector<8x1xi32>
    %74 = arith.extui %73 : vector<8x1xi1> to vector<8x1xi32>
    %75 = arith.sitofp %74 : vector<8x1xi32> to vector<8x1xf32>
    %76 = arith.subf %67, %70 : vector<8x1xf32>
    %77 = arith.mulf %76, %75 : vector<8x1xf32>
    %78 = vector.shape_cast %77 : vector<8x1xf32> to vector<1x8x1xf32>
    %cst_25 = arith.constant dense<0.000000e+00> : vector<1xf32>
    %79 = vector.multi_reduction <add>, %78, %cst_25 [1, 2] : vector<1x8x1xf32> to vector<1xf32>
    %80 = vector.shape_cast %79 : vector<1xf32> to vector<1x1x1xf32>
    %81 = vector.extract %80[0, 0, 0] : f32 from vector<1x1x1xf32>
    %cst_26 = arith.constant 1.250000e-01 : f32
    %82 = arith.mulf %81, %cst_26 : f32
    %c0_27 = arith.constant 0 : index
    %c0_28 = arith.constant 0 : index
    %83 = memref.load %arg2[%c0_27, %c0_28] : memref<1x1xf32, #tpu.memory_space<smem>>
    memref.store %82, %arg2[%c0_27, %c0_28] : memref<1x1xf32, #tpu.memory_space<smem>>
    return
  }
}

</mosaic_0001>

<bundles_post_ra>
// kernel: angular_prototypical_loss.1
= control target key start
LH: loop header
LB: loop body
LE: loop exit
PB: predicated region body
PF: predicated region fallthrough
CT: control target
= control target key end

     0   :  { %s712_s0 = inlined_call_operand.vmem [shape: f32[8,128], index: 0, kind: input, shape index: {}]   ;;  %s713_s1 = inlined_call_operand.vmem [shape: s32[8,1], index: 1, kind: input, shape index: {}]   ;;  %s714_s2 = inlined_call_operand.hbm [shape: f32[1,1], index: 2, kind: output, shape index: {}]  }
   0x1   :  { %v12_v0 = vld [vmem:[%s712_s0] sm:$0xff] }
   0x2   :  { %7 = vsyncpa [#allocation3], 0  ;;  %v14_v1 = vmul.f32 %v12_v0, %v12_v0  ;;  %v13_v2 = vld [vmem:[%s713_s1] sm:$0xff]  ;;  %v627_v3 = vmov 0   ;;  %v20_v8 = vlaneseq  ;;  %v628_v11 = vmov 1.0   ;;  %s615_s15 = scalar_lea.hbm %s714_s2, 16 }
   0x3   :  { %604 = vset.pattern.permute.xlu0 %v627_v3  ;;  %vm66_vm1 = vcmask 64512   ;;  %v629_v28 = vmov 0.0|0.0   ;;  %vm630_vm2 = vmmov 0   ;;  %v631_v29 = vmov 0.0   ;;  %p616_p0 = scmp.ne.s32.totalorder %s714_s2, %s615_s15  ;;  %p619_p1 = scmp.lt.u32.totalorder %s615_s15, %s714_s2 }
   0x4   :  { %15 = vadd.xlane.f32.xlu0 %v14_v1  ;;  %v658_v9 = vand.u32 127, %v20_v8  ;;  %571 = vmatprep.subr.bf16.mxu1 %v629_v28  ;;  %vm429_vm8 = vcmask 7168  }
   0x5   :  { %568 = vmatprep.mubr.msk.f32.mxu1 %vm630_vm2, %v631_v29  ;;  %p621_p2 = pnand %p619_p1, %p616_p0 }
  0x1a   :  { %23 = vperm.xlu0 %604, %v13_v2  }
  0x91   :  { %v16_v4 = vpop.xlane.xlu0 %15 }
  0x92   :  { %v17_v5 = vmax.f32 %v16_v4, 1e-24 }
  0x94   :  { %605 = vrsqrt.f32 %v17_v5 }
  0x99   :  { %v660_v10 = vpop.permute.xlu0 %23 }
  0x9a   :  { %vm25_vm0 = vcmp.eq.s32.totalorder %v660_v10, %v658_v9 }
  0x9b   :  { %510 = vmatprep.subr.msk.mxu0 %vm25_vm0, %v628_v11 }
  0x9c   :  { %511 = vmatpush3.msk.msra.mxu0 %vm25_vm0, %v628_v11 }
  0x9e   :  { %v606_v6 = vpop.eup %605 }
  0x9f   :  { %v655_v7 = vmul.f32 %v606_v6, %v12_v0 }
  0xa1   :  { %34 = vxpose.xlu1.b32.start.end [1/1] (short) %v655_v7, 128 }
 0x121   :  { %v50_v12 = vpop.trf.xlu1 }
 0x122   :  { %512 = vmatprep.mubr.msk.f32.mxu0 %vm66_vm1, %v50_v12 }
 0x125   :  { %v51_v13 = vpop.trf.xlu1 }
 0x126   :  { %513 = vmatmul.mubr.msk.f32.vlgmr.msra.gmra.mrb[0].mxu0 %vm66_vm1, %v51_v13 }
 0x129   :  { %v52_v14 = vpop.trf.xlu1 }
 0x12a   :  { %515 = vmatprep.mubr.msk.f32.mxu0 %vm66_vm1, %v52_v14 }
 0x12d   :  { %v53_v15 = vpop.trf.xlu1 }
 0x12e   :  { %516 = vmatmul.mubr.msk.f32.gmra.mrb[2].mxu0 %vm66_vm1, %v53_v15 }
 0x131   :  { %v54_v16 = vpop.trf.xlu1 }
 0x132   :  { %518 = vmatprep.mubr.msk.f32.mxu0 %vm66_vm1, %v54_v16 }
 0x135   :  { %v55_v17 = vpop.trf.xlu1 }
 0x136   :  { %519 = vmatmul.mubr.msk.f32.gmra.mrb[4].mxu0 %vm66_vm1, %v55_v17 }
 0x139   :  { %v56_v18 = vpop.trf.xlu1 }
 0x13a   :  { %521 = vmatprep.mubr.msk.f32.mxu0 %vm66_vm1, %v56_v18 }
 0x13d   :  { %v57_v19 = vpop.trf.xlu1 }
 0x13e   :  { %522 = vmatmul.mubr.msk.f32.gmra.mrb[6].mxu0 %vm66_vm1, %v57_v19 }
 0x141   :  { %v58_v20 = vpop.trf.xlu1 }
 0x142   :  { %524 = vmatprep.mubr.msk.f32.mxu0 %vm66_vm1, %v58_v20 }
 0x145   :  { %v59_v21 = vpop.trf.xlu1 }
 0x146   :  { %525 = vmatmul.mubr.msk.f32.gmra.mrb[8].mxu0 %vm66_vm1, %v59_v21 }
 0x149   :  { %v60_v22 = vpop.trf.xlu1 }
 0x14a   :  { %527 = vmatprep.mubr.msk.f32.mxu0 %vm66_vm1, %v60_v22 }
 0x14d   :  { %v61_v23 = vpop.trf.xlu1 }
 0x14e   :  { %528 = vmatmul.mubr.msk.f32.gmra.mrb[10].mxu0 %vm66_vm1, %v61_v23 }
 0x151   :  { %v62_v24 = vpop.trf.xlu1 }
 0x152   :  { %530 = vmatprep.mubr.msk.f32.mxu0 %vm66_vm1, %v62_v24 }
 0x155   :  { %v63_v25 = vpop.trf.xlu1 }
 0x156   :  { %531 = vmatmul.mubr.msk.f32.gmra.mrb[12].mxu0 %vm66_vm1, %v63_v25 }
 0x159   :  { %v64_v26 = vpop.trf.xlu1 }
 0x15a   :  { %533 = vmatprep.mubr.msk.f32.mxu0 %vm66_vm1, %v64_v26 }
 0x15d   :  { %v65_v27 = vpop.trf.xlu1 }
 0x15e   :  { %534 = vmatmul.mubr.msk.f32.gmra.mrb[14].mxu0 %vm66_vm1, %v65_v27 }
 0x1f9   :  { %v514_v30 = vpop.f32.mrb[0].mxu0 }
 0x1fa   :  { %v261_v31 = vmul.f32 %v514_v30, %v514_v30  ;;  %v181_v32 = vpop.f32.mrb[1].mxu0 }
 0x1fb   :  { %v260_v33 = vmul.f32 %v181_v32, %v181_v32 }
 0x1fd   :  { %v276_v34 = vadd.f32 %v261_v31, %v260_v33 }
 0x201   :  { %v517_v35 = vpop.f32.mrb[2].mxu0 }
 0x202   :  { %v191_v36 = vpop.f32.mrb[3].mxu0  ;;  %v263_v38 = vmul.f32 %v517_v35, %v517_v35 }
 0x203   :  { %v262_v37 = vmul.f32 %v191_v36, %v191_v36 }
 0x205   :  { %v277_v39 = vadd.f32 %v276_v34, %v262_v37 }
 0x207   :  { %v278_v40 = vadd.f32 %v277_v39, %v263_v38 }
 0x209   :  { %v520_v41 = vpop.f32.mrb[4].mxu0 }
 0x20a   :  { %v201_v42 = vpop.f32.mrb[5].mxu0  ;;  %v265_v44 = vmul.f32 %v520_v41, %v520_v41 }
 0x20b   :  { %v264_v43 = vmul.f32 %v201_v42, %v201_v42 }
 0x20d   :  { %v279_v45 = vadd.f32 %v278_v40, %v264_v43 }
 0x20f   :  { %v280_v46 = vadd.f32 %v279_v45, %v265_v44 }
 0x211   :  { %v523_v47 = vpop.f32.mrb[6].mxu0 }
 0x212   :  { %v211_v48 = vpop.f32.mrb[7].mxu0  ;;  %v267_v50 = vmul.f32 %v523_v47, %v523_v47 }
 0x213   :  { %v266_v49 = vmul.f32 %v211_v48, %v211_v48 }
 0x215   :  { %v281_v51 = vadd.f32 %v280_v46, %v266_v49 }
 0x217   :  { %v282_v52 = vadd.f32 %v281_v51, %v267_v50 }
 0x219   :  { %v526_v53 = vpop.f32.mrb[8].mxu0 }
 0x21a   :  { %v221_v54 = vpop.f32.mrb[9].mxu0  ;;  %v269_v56 = vmul.f32 %v526_v53, %v526_v53 }
 0x21b   :  { %v268_v55 = vmul.f32 %v221_v54, %v221_v54 }
 0x21d   :  { %v283_v57 = vadd.f32 %v282_v52, %v268_v55 }
 0x21f   :  { %v284_v58 = vadd.f32 %v283_v57, %v269_v56 }
 0x221   :  { %v529_v59 = vpop.f32.mrb[10].mxu0 }
 0x222   :  { %v231_v60 = vpop.f32.mrb[11].mxu0  ;;  %v271_v62 = vmul.f32 %v529_v59, %v529_v59 }
 0x223   :  { %v270_v61 = vmul.f32 %v231_v60, %v231_v60 }
 0x225   :  { %v285_v63 = vadd.f32 %v284_v58, %v270_v61 }
 0x227   :  { %v286_v0 = vadd.f32 %v285_v63, %v271_v62 }
 0x229   :  { %v532_v1 = vpop.f32.mrb[12].mxu0 }
 0x22a   :  { %v241_v2 = vpop.f32.mrb[13].mxu0  ;;  %v273_v4 = vmul.f32 %v532_v1, %v532_v1 }
 0x22b   :  { %v272_v3 = vmul.f32 %v241_v2, %v241_v2 }
 0x22d   :  { %v287_v5 = vadd.f32 %v286_v0, %v272_v3 }
 0x22f   :  { %v288_v6 = vadd.f32 %v287_v5, %v273_v4 }
 0x231   :  { %v535_v8 = vpop.f32.mrb[14].mxu0 }
 0x232   :  { %v251_v11 = vpop.f32.mrb[15].mxu0  ;;  %v275_v13 = vmul.f32 %v535_v8, %v535_v8 }
 0x233   :  { %v274_v12 = vmul.f32 %v251_v11, %v251_v11 }
 0x235   :  { %v289_v14 = vadd.f32 %v288_v6, %v274_v12 }
 0x237   :  { %v290_v15 = vadd.f32 %v289_v14, %v275_v13 }
 0x239   :  { %v291_v16 = vrot.slane %v290_v15, 4 }
 0x23b   :  { %v292_v17 = vadd.f32 %v291_v16, %v290_v15 }
 0x23d   :  { %v293_v18 = vrot.slane %v292_v17, 2 }
 0x23f   :  { %v294_v19 = vadd.f32 %v293_v18, %v292_v17 }
 0x241   :  { %v295_v20 = vrot.slane %v294_v19, 1 }
 0x243   :  { %v296_v21 = vadd.f32 %v295_v20, %v294_v19 }
 0x245   :  { %v297_v22 = vmax.f32 %v296_v21, 1e-24 }
 0x247   :  { %607 = vrsqrt.f32 %v297_v22 }
 0x251   :  { %v608_v23 = vpop.eup %607 }
 0x252   :  { %v313_v24 = vmul.f32 %v608_v23, %v251_v11  ;;  %v314_v25 = vmul.f32 %v608_v23, %v535_v8  ;;  %v299_v26 = vmul.f32 %v608_v23, %v181_v32  ;;  %v300_v27 = vmul.f32 %v608_v23, %v514_v30 }
 0x253   :  { %v301_v31 = vmul.f32 %v608_v23, %v191_v36  ;;  %v302_v33 = vmul.f32 %v608_v23, %v517_v35  ;;  %v303_v34 = vmul.f32 %v608_v23, %v201_v42  ;;  %v304_v37 = vmul.f32 %v608_v23, %v520_v41 }
 0x254   :  { %v593_v38 = vpack.c.bf16 %v314_v25, %v313_v24  ;;  %v572_v39 = vpack.c.bf16 %v300_v27, %v299_v26  ;;  %v305_v40 = vmul.f32 %v608_v23, %v211_v48  ;;  %v306_v43 = vmul.f32 %v608_v23, %v523_v47 }
 0x255   :  { %v575_v44 = vpack.c.bf16 %v302_v33, %v301_v31  ;;  %v578_v45 = vpack.c.bf16 %v304_v37, %v303_v34  ;;  %v307_v46 = vmul.f32 %v608_v23, %v221_v54  ;;  %v308_v49 = vmul.f32 %v608_v23, %v526_v53 }
 0x256   :  { %573 = vmatpush3.bf16.msra.mxu1 %v572_v39  ;;  %v581_v50 = vpack.c.bf16 %v306_v43, %v305_v40  ;;  %v309_v51 = vmul.f32 %v608_v23, %v231_v60  ;;  %v310_v52 = vmul.f32 %v608_v23, %v529_v59  ;;  %v311_v55 = vmul.f32 %v608_v23, %v241_v2 }
 0x257   :  { %574 = vmatprep.subr.bf16.mxu1 %v629_v28  ;;  %v584_v30 = vpack.c.bf16 %v308_v49, %v307_v46  ;;  %v312_v32 = vmul.f32 %v608_v23, %v532_v1  ;;  %v456_v42 = vsel %vm25_vm0, 1.0, %v631_v29  ;;  %v632_v8 = vmov -1e+30  }
 0x258   :  { %v587_v35 = vpack.c.bf16 %v310_v52, %v309_v51  ;;  %v28_v54 = vrot.slane %v456_v42, 4  ;;  %vm403_vm6 = vcmp.gt.f32.partialorder %v456_v42, 0.0 }
 0x259   :  { %v590_v36 = vpack.c.bf16 %v312_v32, %v311_v55 }
 0x25a   :  { %576 = vmatpush3.bf16.msra.mxu1 %v575_v44  ;;  %v29_v58 = vadd.f32 %v456_v42, %v28_v54 }
 0x25b   :  { %577 = vmatprep.subr.bf16.mxu1 %v629_v28 }
 0x25c   :  { %v30_v59 = vrot.slane %v29_v58, 2 }
 0x25e   :  { %579 = vmatpush3.bf16.msra.mxu1 %v578_v45  ;;  %v31_v60 = vadd.f32 %v30_v59, %v29_v58 }
 0x25f   :  { %580 = vmatprep.subr.bf16.mxu1 %v629_v28 }
 0x260   :  { %v32_v62 = vrot.slane %v31_v60, 1 }
 0x262   :  { %582 = vmatpush3.bf16.msra.mxu1 %v581_v50  ;;  %v33_v1 = vadd.f32 %v32_v62, %v31_v60 }
 0x263   :  { %583 = vmatprep.subr.bf16.mxu1 %v629_v28 }
 0x264   :  { %vm406_vm7 = vcmp.gt.f32.partialorder %v33_v1, 0.0 }
 0x265   :  { %v407_v11 = vsel %vm406_vm7, 0.0, %v632_v8 }
 0x266   :  { %585 = vmatpush3.bf16.msra.mxu1 %v584_v30 }
 0x267   :  { %586 = vmatprep.subr.bf16.mxu1 %v629_v28 }
 0x26a   :  { %588 = vmatpush3.bf16.msra.mxu1 %v587_v35 }
 0x26b   :  { %589 = vmatprep.subr.bf16.mxu1 %v629_v28 }
 0x26e   :  { %591 = vmatpush3.bf16.msra.mxu1 %v590_v36 }
 0x26f   :  { %592 = vmatprep.subr.bf16.mxu1 %v629_v28 }
 0x272   :  { %594 = vmatpush3.bf16.msra.mxu1 %v593_v38 }
 0x275   :  { %569 = vmatmul.mubr.f32.vlgmr.msra.gmra.mrb[0].mxu1 %v655_v7 }
 0x348   :  { %v381_v41 = vpop.f32.mrb[0].mxu1 }
 0x349   :  { %v385_v47 = vmul.f32 %v381_v41, %v381_v41  ;;  %v570_v48 = vpop.f32.mrb[1].mxu1  ;;  %v474_v9 = vadd.f32 0.9800666, %v381_v41  ;;  %v396_v10 = vmul.f32 0.9800666, %v381_v41 }
 0x34a   :  { %v475_v3 = vadd.f32 -0.2, %v381_v41 }
 0x34b   :  { %v386_v53 = vsub.f32 1.0, %v385_v47  ;;  %vm400_vm5 = vcmp.gt.f32.partialorder %v474_v9, 0.0 }
 0x34d   :  { %v387_v56 = vmax.f32 %v386_v53, 0.0 }
 0x34f   :  { %v388_v57 = vmin.f32 %v387_v56, 1.0 }
 0x351   :  { %609 = vrsqrt.f32 %v388_v57  ;;  %vm391_vm3 = vcmp.eq.f32.partialorder %v388_v57, inf  ;;  %v394_v7 = vand.u32 2147483648, %v388_v57  ;;  %vm393_vm4 = vcmp.eq.f32.partialorder %v388_v57, 0.0 }
 0x35b   :  { %v610_v28 = vpop.eup %609 }
 0x35c   :  { %v390_v61 = vmul.f32 %v610_v28, %v388_v57 }
 0x35e   :  { %v392_v63 = vsel %vm391_vm3, %v388_v57, %v390_v61 }
 0x35f   :  { %v395_v0 = vsel %vm393_vm4, %v394_v7, %v392_v63 }
 0x360   :  { %v397_v29 = vmul.f32 0.19866933, %v395_v0 }
 0x362   :  { %v398_v2 = vsub.f32 %v396_v10, %v397_v29 }
 0x364   :  { %v402_v4 = vsel %vm400_vm5, %v398_v2, %v475_v3 }
 0x365   :  { %v404_v5 = vsel %vm403_vm6, %v402_v4, %v381_v41 }
 0x366   :  { %v405_v6 = vmul.f32 10.0, %v404_v5 }
 0x368   :  { %v408_v12 = vadd.f32 %v407_v11, %v405_v6 }
 0x36a   :  { %409 = vmax.xlane.f32.xlu1 %v408_v12  ;;  %v419_v17 = vmul.f32 %v456_v42, %v408_v12 }
 0x3f7   :  { %v410_v13 = vpop.xlane.xlu1 %409 }
 0x3f8   :  { %v411_v14 = vsub.f32 %v408_v12, %v410_v13 }
 0x3fa   :  { %v412_v15 = vmul.f32 1.442695, %v411_v14 }
 0x3fc   :  { %611 = vpow2.f32 %v412_v15 }
 0x406   :  { %v612_v16 = vpop.eup %611 }
 0x407   :  { %414 = vadd.xlane.f32.xlu0 %v612_v16 }
 0x40b   :  { %420 = vadd.xlane.f32.xlu0 %v419_v17 }
 0x494   :  { %v415_v18 = vpop.xlane.xlu0 %414 }
 0x495   :  { %613 = vlog2.f32 %v415_v18 }
 0x498   :  { %v421_v22 = vpop.xlane.xlu0 %420 }
 0x49f   :  { %v614_v19 = vpop.eup %613 }
 0x4a0   :  { %v417_v20 = vmul.f32 0.6931472, %v614_v19 }
 0x4a2   :  { %v418_v21 = vadd.f32 %v417_v20, %v410_v13 }
 0x4a4   :  { %v427_v23 = vsub.f32 %v418_v21, %v421_v22 }
 0x4a6   :  { %v430_v24 = vsel %vm429_vm8, %v427_v23, 0.0 }
 0x4a7   :  { %431 = vadd.xlane.f32.xlu0 %v430_v24 }
 0x534   :  { %v432_v25 = vpop.xlane.xlu0 %431 }
 0x535   :  { %v433_v26 = vrot.slane %v432_v25, 4 }
 0x537   :  { %v434_v27 = vadd.f32 %v433_v26, %v432_v25 }
 0x539   :  { %v435_v31 = vrot.slane %v434_v27, 2 }
 0x53b   :  { %v436_v33 = vadd.f32 %v435_v31, %v434_v27 }
 0x53d   :  { %v437_v34 = vrot.slane %v436_v33, 1 }
 0x53f   :  { %v438_v37 = vadd.f32 %v437_v34, %v436_v33 }
 0x541   :  { %595 = vpush %v438_v37 }
 0x572   :  { %s596_s0 = spop %595 }
 0x573   :  { %s440_s1 = smul.f32 0.125, %s596_s0 }
 0x575   :  { %442 = sst [smem:[#allocation2]] %s440_s1 }
 0x576   :  { %624 = shalt.err (!%p621_p2)
}
 0x577   :  { %s633_s20 = smov [#allocation2]  }
 0x578   :  { %450 = dma.smem_to_hbm %s633_s20, 16, %s714_s2, [#allocation3]  }
 0x579   :  { %625 = dma.done.wait [#allocation3], 16  }
 0x57a   :  { %626 = vsyncadd [#allocation3], 4294967280 }
 0x57b   :  { %454 = sfence }
 0x57c   :  { %455 = vsyncpa [#allocation3], 1 }

</bundles_post_ra>
